<compile_context>
chip_gen: v7x
topology: tpu7x:2x2x1
jax: 0.10.0
libtpu: 0.0.40
codegen_flags: <defaults>
</compile_context>

<pallas_src>
import jax
import jax.numpy as jnp
from jax.experimental import pallas as pl
from jax.experimental.pallas import tpu as pltpu


def _round_up(n, m):
    return ((n + m - 1) // m) * m


def _default_target_tm():
    """Per-generation column-tile target (review: v5e ~8K, v6e ~16K, v7x ~32K)."""
    try:
        kind = jax.devices()[0].device_kind.lower()
    except Exception:
        return 8192
    if "v7" in kind:
        return 32768
    if "v6" in kind:
        return 16384
    return 8192


def _select_tm(M, tm):
    if tm is None:
        tm = _default_target_tm()
    tm = max(128, _round_up(tm, 128))
    # Keep the grid at >= ~4 steps when M is large enough: feeds both v7x
    # TensorCores (parallel axis) and keeps the DMA pipeline full.
    cap = max(128, _round_up(pl.cdiv(M, 4), 128))
    return min(tm, cap)


def _make_nnproj_kernel(n_hidden_layers: int, neg_slope: float = 0.2):
    """Kernel computing the full projector chain for one column tile of M."""

    def kernel(x_ref, *refs):
        # refs = (w_1, ..., w_n_hidden, wfn, out)
        w_refs = refs[:n_hidden_layers]
        wfn_ref = refs[n_hidden_layers]        # (final_dim, hidden_dim), pre-normalized
        o_ref = refs[n_hidden_layers + 1]      # (final_dim, tm)

        # First layer: x block arrives in natural (tm, in_features) layout.
        # Contract W1's "in" dim (1) against x's feature dim (1) so the
        # lane-dense (hidden, tm) activation is produced directly on the MXU
        # — no wrapper-side transpose / extra HBM round trip of x.
        w0 = w_refs[0][...]
        h = jax.lax.dot_general(
            w0, x_ref[...].astype(w0.dtype),
            dimension_numbers=(((1,), (1,)), ((), ())),
            preferred_element_type=jnp.float32)            # (hidden, tm), f32
        h = jnp.where(h >= 0.0, h, neg_slope * h)          # LeakyReLU(0.2), f32 VPU

        for w_ref in w_refs[1:]:
            h = jnp.dot(w_ref[...], h.astype(w_ref.dtype),
                        preferred_element_type=jnp.float32)
            h = jnp.where(h >= 0.0, h, neg_slope * h)

        o_ref[...] = jnp.dot(wfn_ref[...], h.astype(wfn_ref.dtype),
                             preferred_element_type=jnp.float32).astype(o_ref.dtype)

    return kernel


def nn_projector_forward(x, hidden_weights, final_projection, *,
                         tm=None, compute_dtype=jnp.bfloat16,
                         lane_major_output=False):
    """
    x:                (..., input_features)   — streamed in its own dtype
    hidden_weights:   list of torch-layout (out_i, in_i) matrices
    final_projection: (final_dim, hidden_dim) torch layout (un-normalized)
    compute_dtype:    MXU input dtype (accumulation is always f32)
    """
    in_features = x.shape[-1]
    lead_shape = x.shape[:-1]
    out_dtype = x.dtype

    x2d = x.reshape(-1, in_features)           # natural layout, no transpose/pad
    M = x2d.shape[0]

    tm = _select_tm(M, tm)
    grid = (pl.cdiv(M, tm),)                   # ragged last block handled by Pallas

    # Grid-invariant weight prep, hoisted out of the kernel (normalize once, f32).
    # Note: like the torch reference, an all-zero row would produce inf/NaN.
    wf = final_projection.astype(jnp.float32)
    wfn = (wf * jax.lax.rsqrt(jnp.sum(wf * wf, axis=1, keepdims=True))
           ).astype(compute_dtype)             # (final_dim, hidden_dim)
    ws = [w.astype(compute_dtype) for w in hidden_weights]

    final_dim = final_projection.shape[0]
    kernel = _make_nnproj_kernel(len(ws))

    # x tiled over rows (M) in natural layout; tiny weights stay fully resident.
    in_specs = [pl.BlockSpec((tm, in_features), lambda i: (i, 0))]
    for w in ws:
        in_specs.append(pl.BlockSpec(w.shape, lambda i: (0, 0)))
    in_specs.append(pl.BlockSpec(wfn.shape, lambda i: (0, 0)))

    out = pl.pallas_call(
        kernel,
        out_shape=jax.ShapeDtypeStruct((final_dim, M), out_dtype),
        grid_spec=pl.GridSpec(
            grid=grid,
            in_specs=in_specs,
            out_specs=pl.BlockSpec((final_dim, tm), lambda i: (0, i)),
        ),
        compiler_params=pltpu.CompilerParams(
            dimension_semantics=("parallel",)),
    )(x2d, *ws, wfn)

    if lane_major_output:
        return out                               # (final_dim, M), lane-dense
    return out.T.reshape(*lead_shape, final_dim)  # torch layout (one XLA transpose)


def _xavier_uniform(key, shape, gain):
    """xavier_uniform on a torch-layout (out, in) matrix."""
    fan_out, fan_in = shape
    limit = gain * jnp.sqrt(6.0 / (fan_in + fan_out))
    return jax.random.uniform(key, shape, jnp.float32, minval=-limit, maxval=limit)


def _reference(x, hidden_weights, final_projection, neg_slope=0.2):
    h = x.reshape(-1, x.shape[-1]).astype(jnp.float32)
    for w in hidden_weights:                       # torch layout (out, in)
        h = h @ w.T
        h = jnp.where(h >= 0, h, neg_slope * h)
    wfn = final_projection / jnp.linalg.norm(final_projection, axis=1, keepdims=True)
    out = h @ wfn.T
    return out.reshape(*x.shape[:-1], final_projection.shape[0])


if __name__ == "__main__":
    # NNProjector(num_layer=3, input_features=16, hidden_dim=32, final_dim=8)
    num_layer = 3
    input_features = 16
    hidden_dim = 32
    final_dim = 8
    B, N = 2, 8  # x: (B, N, input_features)

    key = jax.random.PRNGKey(0)
    kx, k1, k2, kf, kx2 = jax.random.split(key, 5)

    # gain = calculate_gain('leaky_relu') with default param 0.01
    gain = float(jnp.sqrt(2.0 / (1.0 + 0.01 ** 2)))

    # Sequential: Linear(in, hidden), LeakyReLU, Linear(hidden, hidden), LeakyReLU
    # Weights kept in torch (out, in) layout.
    hidden_weights = [
        _xavier_uniform(k1, (hidden_dim, input_features), gain),
        _xavier_uniform(k2, (hidden_dim, hidden_dim), gain),
    ]
    # final_projection ~ randn(final_dim, hidden_dim), normalized per-row at forward
    final_projection = jax.random.normal(kf, (final_dim, hidden_dim), jnp.float32)

    # --- small module-sized test, f32 compute, tight tolerance ---
    x = jax.random.normal(kx, (B, N, input_features), jnp.float32)
    out = nn_projector_forward(x, hidden_weights, final_projection,
                               compute_dtype=jnp.float32)
    out = jax.block_until_ready(out)
    ref = _reference(x, hidden_weights, final_projection)
    assert out.shape == (B, N, final_dim)
    assert jnp.allclose(out, ref, atol=1e-4, rtol=1e-4), "f32 mismatch vs reference"

    # --- bf16-streamed x, ragged M (not a multiple of the tile), multi-step grid ---
    x_big = jax.random.normal(kx2, (4, 300, input_features),
                              jnp.float32).astype(jnp.bfloat16)   # M = 1200
    out_big = nn_projector_forward(x_big, hidden_weights, final_projection)
    out_big = jax.block_until_ready(out_big)
    ref_big = _reference(x_big.astype(jnp.float32), hidden_weights, final_projection)
    assert out_big.shape == (4, 300, final_dim)
    assert jnp.allclose(out_big.astype(jnp.float32), ref_big,
                        atol=1e-1, rtol=1e-1), "bf16 mismatch vs reference"

    print("KERNEL_OK")
</pallas_src>

<mosaic_0001>
module attributes {stable_mosaic.version = 11 : i64} {
  func.func @kernel(%arg0: i32, %arg1: memref<128x16xf32, #tpu.memory_space<vmem>>, %arg2: memref<32x16xf32, #tpu.memory_space<vmem>>, %arg3: memref<32x32xf32, #tpu.memory_space<vmem>>, %arg4: memref<8x32xf32, #tpu.memory_space<vmem>>, %arg5: memref<8x128xf32, #tpu.memory_space<vmem>>) attributes {dimension_semantics = [#tpu.dimension_semantics<parallel>], iteration_bounds = array<i64: 1>, scalar_prefetch = 0 : i64, scratch_operands = 0 : i64, tpu.core_type = #tpu.core_type<tc>, window_params = [{transform_indices = @transform_0, window_bounds = array<i64: 128, 16>}, {pipeline_mode = #tpu.pipeline_mode<synchronous>, transform_indices = @transform_1, window_bounds = array<i64: 32, 16>}, {pipeline_mode = #tpu.pipeline_mode<synchronous>, transform_indices = @transform_2, window_bounds = array<i64: 32, 32>}, {pipeline_mode = #tpu.pipeline_mode<synchronous>, transform_indices = @transform_3, window_bounds = array<i64: 8, 32>}, {transform_indices = @transform_4, window_bounds = array<i64: 8, 128>}]} {
    %c0 = arith.constant 0 : index
    %c0_0 = arith.constant 0 : index
    %0 = vector.load %arg2[%c0, %c0_0] : memref<32x16xf32, #tpu.memory_space<vmem>>, vector<32x16xf32>
    %c0_1 = arith.constant 0 : index
    %c0_2 = arith.constant 0 : index
    %1 = vector.load %arg1[%c0_1, %c0_2] : memref<128x16xf32, #tpu.memory_space<vmem>>, vector<128x16xf32>
    %cst = arith.constant dense<0.000000e+00> : vector<32x128xf32>
    %2 = tpu.matmul %0, %1, %cst {dimension_numbers = #tpu.dot_dimension_numbers<[1], [1], [0], [0], [0, 0, 1, 0], [], []>} : vector<32x16xf32>, vector<128x16xf32>, vector<32x128xf32> -> vector<32x128xf32>
    %cst_3 = arith.constant 0.000000e+00 : f32
    %3 = vector.broadcast %cst_3 : f32 to vector<32x128xf32>
    %4 = arith.cmpf oge, %2, %3 : vector<32x128xf32>
    %cst_4 = arith.constant 2.000000e-01 : f32
    %5 = vector.broadcast %cst_4 : f32 to vector<32x128xf32>
    %6 = arith.mulf %5, %2 : vector<32x128xf32>
    %7 = arith.select %4, %2, %6 : vector<32x128xi1>, vector<32x128xf32>
    %c0_5 = arith.constant 0 : index
    %c0_6 = arith.constant 0 : index
    %8 = vector.load %arg3[%c0_5, %c0_6] : memref<32x32xf32, #tpu.memory_space<vmem>>, vector<32x32xf32>
    %cst_7 = arith.constant dense<0.000000e+00> : vector<32x128xf32>
    %9 = tpu.matmul %8, %7, %cst_7 {dimension_numbers = #tpu.dot_dimension_numbers<[1], [0], [0], [1], [0, 0, 1, 1], [], []>} : vector<32x32xf32>, vector<32x128xf32>, vector<32x128xf32> -> vector<32x128xf32>
    %cst_8 = arith.constant 0.000000e+00 : f32
    %10 = vector.broadcast %cst_8 : f32 to vector<32x128xf32>
    %11 = arith.cmpf oge, %9, %10 : vector<32x128xf32>
    %cst_9 = arith.constant 2.000000e-01 : f32
    %12 = vector.broadcast %cst_9 : f32 to vector<32x128xf32>
    %13 = arith.mulf %12, %9 : vector<32x128xf32>
    %14 = arith.select %11, %9, %13 : vector<32x128xi1>, vector<32x128xf32>
    %c0_10 = arith.constant 0 : index
    %c0_11 = arith.constant 0 : index
    %15 = vector.load %arg4[%c0_10, %c0_11] : memref<8x32xf32, #tpu.memory_space<vmem>>, vector<8x32xf32>
    %cst_12 = arith.constant dense<0.000000e+00> : vector<8x128xf32>
    %16 = tpu.matmul %15, %14, %cst_12 {dimension_numbers = #tpu.dot_dimension_numbers<[1], [0], [0], [1], [0, 0, 1, 1], [], []>} : vector<8x32xf32>, vector<32x128xf32>, vector<8x128xf32> -> vector<8x128xf32>
    %c0_13 = arith.constant 0 : index
    %c0_14 = arith.constant 0 : index
    %17 = vector.load %arg5[%c0_13, %c0_14] : memref<8x128xf32, #tpu.memory_space<vmem>>, vector<8x128xf32>
    tpu.vector_store %arg5[%c0_13, %c0_14], %16 {strides = array<i32>} : memref<8x128xf32, #tpu.memory_space<vmem>>, vector<8x128xf32>,
    return
  }
  func.func @transform_0(%arg0: i32) -> (i32, i32) {
    %c0_i32 = arith.constant 0 : i32
    %c0_i32_0 = arith.constant 0 : i32
    return %arg0, %c0_i32 : i32, i32
  }
  func.func @transform_1(%arg0: i32) -> (i32, i32) {
    %c0_i32 = arith.constant 0 : i32
    %c0_i32_0 = arith.constant 0 : i32
    %c0_i32_1 = arith.constant 0 : i32
    return %c0_i32, %c0_i32_0 : i32, i32
  }
  func.func @transform_2(%arg0: i32) -> (i32, i32) {
    %c0_i32 = arith.constant 0 : i32
    %c0_i32_0 = arith.constant 0 : i32
    %c0_i32_1 = arith.constant 0 : i32
    return %c0_i32, %c0_i32_0 : i32, i32
  }
  func.func @transform_3(%arg0: i32) -> (i32, i32) {
    %c0_i32 = arith.constant 0 : i32
    %c0_i32_0 = arith.constant 0 : i32
    %c0_i32_1 = arith.constant 0 : i32
    return %c0_i32, %c0_i32_0 : i32, i32
  }
  func.func @transform_4(%arg0: i32) -> (i32, i32) {
    %c0_i32 = arith.constant 0 : i32
    %c0_i32_0 = arith.constant 0 : i32
    return %c0_i32, %arg0 : i32, i32
  }
}

</mosaic_0001>

<bundles_post_ra>
// kernel: tpu_custom_call.1
= control target key start
LH: loop header
LB: loop body
LE: loop exit
PB: predicated region body
PF: predicated region fallthrough
CT: control target
= control target key end

     0   :  { %vm38_vm0 = vcmask 130048   ;;  %s773_s0 = inlined_call_operand.vmem [shape: f32[16,16], index: 0, kind: input, shape index: {}]   ;;  %s774_s1 = inlined_call_operand.vmem [shape: f32[32,16], index: 1, kind: input, shape index: {}]   ;;  %s775_s2 = inlined_call_operand.vmem [shape: f32[32,32], index: 2, kind: input, shape index: {}]   ;;  %s776_s3 = inlined_call_operand.vmem [shape: f32[8,32], index: 3, kind: input, shape index: {}]   ;;  %s777_s4 = inlined_call_operand.hbm [shape: f32[8,16], index: 4, kind: output, shape index: {}]  }
   0x1   :  { %v22_v0 = vld [vmem:[%s773_s0] sm:$0xff]  ;;  %v23_v1 = vld [vmem:[%s773_s0 + $0x8] sm:$0xff]  ;;  %v24_v2 = vld [vmem:[%s773_s0 + $0x10] sm:$0xff] }
   0x2   :  { %v520_v3 = vpack.c.bf16 %v23_v1, %v22_v0  ;;  %vm650_vm1 = vmpackc.low %vm38_vm0, %vm38_vm0  ;;  %v25_v5 = vld [vmem:[%s773_s0 + $0x18] sm:$0xff]  ;;  %v18_v7 = vld [vmem:[%s774_s1] sm:$0xff] }
   0x3   :  { %v526_v6 = vpack.c.bf16 %v25_v5, %v24_v2  ;;  %v26_v8 = vld [vmem:[%s773_s0 + $0x20] sm:$0xff]  ;;  %v27_v9 = vld [vmem:[%s773_s0 + $0x28] sm:$0xff]  ;;  %489 = vmatprep.mubr.msk.f32.mxu0 %vm38_vm0, %v18_v7 }
   0x4   :  { %522 = vmatprep.subr.msk.bf16.mxu0 %vm650_vm1, %v520_v3 }
   0x5   :  { %525 = vmatpush3.bf16.xpose.msk.msra.mxu0 %vm650_vm1, %v520_v3 }
   0x6   :  { %528 = vmatprep.subr.msk.bf16.mxu0 %vm650_vm1, %v526_v6 }
   0x7   :  { %9 = vsyncpa [#allocation3], 0  ;;  %v532_v10 = vpack.c.bf16 %v27_v9, %v26_v8  ;;  %v28_v11 = vld [vmem:[%s773_s0 + $0x30] sm:$0xff]  ;;  %v29_v12 = vld [vmem:[%s773_s0 + $0x38] sm:$0xff]  ;;  %vm200_vm2 = vcmask 261120   ;;  %v610_v47 = vmov 0.0|0.0  }
   0x8   :  { %v538_v13 = vpack.c.bf16 %v29_v12, %v28_v11  ;;  %v30_v14 = vld [vmem:[%s773_s0 + $0x40] sm:$0xff]  ;;  %v31_v15 = vld [vmem:[%s773_s0 + $0x48] sm:$0xff]  ;;  %v32_v17 = vld [vmem:[%s773_s0 + $0x50] sm:$0xff]  ;;  %vm611_vm7 = vmmov 0   ;;  %v612_v48 = vmov 0.0   ;;  %s613_s10 = smov [#allocation2]  }
   0x9   :  { %v544_v16 = vpack.c.bf16 %v31_v15, %v30_v14  ;;  %v33_v18 = vld [vmem:[%s773_s0 + $0x58] sm:$0xff]  ;;  %v34_v20 = vld [vmem:[%s773_s0 + $0x60] sm:$0xff]  ;;  %v35_v21 = vld [vmem:[%s773_s0 + $0x68] sm:$0xff]  ;;  %s391_s11 = sshll.u32 %s613_s10, 4  ;;  %s392_s11 = int_to_ptr.vmem [resolvable:$true] %s391_s11 }
   0xa   :  { %v550_v19 = vpack.c.bf16 %v33_v18, %v32_v17  ;;  %v556_v22 = vpack.c.bf16 %v35_v21, %v34_v20  ;;  %v36_v23 = vld [vmem:[%s773_s0 + $0x70] sm:$0xff]  ;;  %v37_v24 = vld [vmem:[%s773_s0 + $0x78] sm:$0xff]  ;;  %v19_v26 = vld [vmem:[%s774_s1 + $0x8] sm:$0xff]  ;;  %s586_s12 = scalar_lea.vmem %s392_s11, 128  ;;  %p591_p1 = scmp.lt.s32.totalorder %s392_s11, %s392_s11 }
   0xb   :  { %v562_v25 = vpack.c.bf16 %v37_v24, %v36_v23  ;;  %v20_v27 = vld [vmem:[%s774_s1 + $0x10] sm:$0xff]  ;;  %v21_v28 = vld [vmem:[%s774_s1 + $0x18] sm:$0xff]  ;;  %v196_v29 = vld [vmem:[%s775_s2] sm:$0xff]  ;;  %p587_p0 = scmp.ne.s32.totalorder %s392_s11, %s586_s12  ;;  %p592_p2 = scmp.lt.s32.totalorder %s586_s12, %s586_s12 }
   0xc   :  { %503 = vmatprep.mubr.msk.f32.mxu1 %vm200_vm2, %v196_v29  ;;  %v197_v44 = vld [vmem:[%s775_s2 + $0x8] sm:$0xff]  ;;  %v198_v45 = vld [vmem:[%s775_s2 + $0x10] sm:$0xff]  ;;  %v199_v46 = vld [vmem:[%s775_s2 + $0x18] sm:$0xff] }
   0xd   :  { %531 = vmatpush3.bf16.xpose.msk.msra.mxu0 %vm650_vm1, %v526_v6  ;;  %v310_v63 = vld [vmem:[%s776_s3] sm:$0xff]  ;;  %p593_p3 = por %p592_p2, %p591_p1 }
   0xe   :  { %534 = vmatprep.subr.msk.bf16.mxu0 %vm650_vm1, %v532_v10 }
   0xf   :  { %p594_p4 = pnand %p593_p3, %p587_p0 }
  0x15   :  { %537 = vmatpush3.bf16.xpose.msk.msra.mxu0 %vm650_vm1, %v532_v10 }
  0x16   :  { %540 = vmatprep.subr.msk.bf16.mxu0 %vm650_vm1, %v538_v13 }
  0x1d   :  { %543 = vmatpush3.bf16.xpose.msk.msra.mxu0 %vm650_vm1, %v538_v13 }
  0x1e   :  { %546 = vmatprep.subr.msk.bf16.mxu0 %vm650_vm1, %v544_v16 }
  0x25   :  { %549 = vmatpush3.bf16.xpose.msk.msra.mxu0 %vm650_vm1, %v544_v16 }
  0x26   :  { %552 = vmatprep.subr.msk.bf16.mxu0 %vm650_vm1, %v550_v19 }
  0x2d   :  { %555 = vmatpush3.bf16.xpose.msk.msra.mxu0 %vm650_vm1, %v550_v19 }
  0x2e   :  { %558 = vmatprep.subr.msk.bf16.mxu0 %vm650_vm1, %v556_v22 }
  0x35   :  { %561 = vmatpush3.bf16.xpose.msk.msra.mxu0 %vm650_vm1, %v556_v22 }
  0x36   :  { %564 = vmatprep.subr.msk.bf16.mxu0 %vm650_vm1, %v562_v25 }
  0x3d   :  { %567 = vmatpush3.bf16.xpose.msk.msra.mxu0 %vm650_vm1, %v562_v25 }
  0x44   :  { %490 = vmatmul.mubr.msk.f32.vlgmr.msra.gmra.mrb[0].mxu0 %vm38_vm0, %v19_v26 }
  0x45   :  { %492 = vmatprep.mubr.msk.f32.mxu0 %vm38_vm0, %v20_v27 }
  0x48   :  { %493 = vmatmul.mubr.msk.f32.gmra.mrb[2].mxu0 %vm38_vm0, %v21_v28 }
 0x117   :  { %v491_v30 = vpop.f32.mrb[0].mxu0 }
 0x118   :  { %vm185_vm3 = vcmp.ge.f32.partialorder %v491_v30, 0.0  ;;  %v189_v31 = vmul.f32 0.2, %v491_v30  ;;  %v165_v32 = vpop.f32.mrb[1].mxu0 }
 0x119   :  { %vm184_vm4 = vcmp.ge.f32.partialorder %v165_v32, 0.0  ;;  %v188_v33 = vmul.f32 0.2, %v165_v32 }
 0x11a   :  { %v193_v34 = vsel %vm185_vm3, %v491_v30, %v189_v31 }
 0x11b   :  { %v494_v35 = vpop.f32.mrb[2].mxu0  ;;  %v192_v36 = vsel %vm184_vm4, %v165_v32, %v188_v33 }
 0x11c   :  { %vm187_vm5 = vcmp.ge.f32.partialorder %v494_v35, 0.0  ;;  %v191_v37 = vmul.f32 0.2, %v494_v35  ;;  %v175_v38 = vpop.f32.mrb[3].mxu0  ;;  %v568_v39 = vpack.c.bf16 %v193_v34, %v192_v36 }
 0x11d   :  { %vm186_vm6 = vcmp.ge.f32.partialorder %v175_v38, 0.0  ;;  %v190_v40 = vmul.f32 0.2, %v175_v38 }
 0x11e   :  { %v195_v41 = vsel %vm187_vm5, %v494_v35, %v191_v37  ;;  %569 = vmatprep.subr.bf16.mxu1 %v568_v39 }
 0x11f   :  { %v194_v42 = vsel %vm186_vm6, %v175_v38, %v190_v40  ;;  %571 = vmatpush3.bf16.msra.mxu1 %v568_v39 }
 0x120   :  { %v572_v43 = vpack.c.bf16 %v195_v41, %v194_v42 }
 0x122   :  { %573 = vmatprep.subr.bf16.mxu1 %v572_v43 }
 0x123   :  { %575 = vmatpush3.bf16.msra.mxu1 %v572_v43 }
 0x124   :  { %576 = vmatprep.subr.bf16.mxu1 %v610_v47 }
 0x126   :  { %504 = vmatmul.mubr.msk.f32.vlgmr.msra.gmra.mrb[0].mxu1 %vm200_vm2, %v197_v44 }
 0x127   :  { %506 = vmatprep.mubr.msk.f32.mxu1 %vm200_vm2, %v198_v45 }
 0x12a   :  { %507 = vmatmul.mubr.msk.f32.gmra.mrb[2].mxu1 %vm200_vm2, %v199_v46 }
 0x12b   :  { %517 = vmatprep.mubr.msk.f32.mxu1 %vm611_vm7, %v612_v48 }
 0x1f9   :  { %v505_v49 = vpop.f32.mrb[0].mxu1 }
 0x1fa   :  { %vm299_vm8 = vcmp.ge.f32.partialorder %v505_v49, 0.0  ;;  %v303_v50 = vmul.f32 0.2, %v505_v49  ;;  %v279_v51 = vpop.f32.mrb[1].mxu1 }
 0x1fb   :  { %vm298_vm9 = vcmp.ge.f32.partialorder %v279_v51, 0.0  ;;  %v302_v52 = vmul.f32 0.2, %v279_v51 }
 0x1fc   :  { %v307_v53 = vsel %vm299_vm8, %v505_v49, %v303_v50 }
 0x1fd   :  { %v306_v54 = vsel %vm298_vm9, %v279_v51, %v302_v52  ;;  %v508_v55 = vpop.f32.mrb[2].mxu1 }
 0x1fe   :  { %v577_v56 = vpack.c.bf16 %v307_v53, %v306_v54  ;;  %vm301_vm10 = vcmp.ge.f32.partialorder %v508_v55, 0.0  ;;  %v305_v57 = vmul.f32 0.2, %v508_v55  ;;  %v289_v58 = vpop.f32.mrb[3].mxu1 }
 0x1ff   :  { %vm300_vm11 = vcmp.ge.f32.partialorder %v289_v58, 0.0  ;;  %v304_v59 = vmul.f32 0.2, %v289_v58 }
 0x200   :  { %v309_v60 = vsel %vm301_vm10, %v508_v55, %v305_v57  ;;  %578 = vmatpush3.bf16.msra.mxu1 %v577_v56 }
 0x201   :  { %v308_v61 = vsel %vm300_vm11, %v289_v58, %v304_v59  ;;  %579 = vmatprep.subr.bf16.mxu1 %v610_v47 }
 0x202   :  { %v580_v62 = vpack.c.bf16 %v309_v60, %v308_v61 }
 0x204   :  { %581 = vmatpush3.bf16.msra.mxu1 %v580_v62 }
 0x207   :  { %518 = vmatmul.mubr.msk.f32.vlgmr.msra.gmra.mrb[4].mxu1 %vm200_vm2, %v310_v63 }
 0x2da   :  { %v380_v0 = vpop.f32.mrb[4].mxu1 }
 0x2db   :  { %384 = vst [vmem:[#allocation2] sm:$0xff] %v380_v0  ;;  %v519_v1 = vpop.f32.mrb[5].mxu1 }
 0x2dc   :  { %597 = shalt.err (!%p594_p4)
}
 0x2dd   :  { %s598_s15 = scalar_lea.hbm %s777_s4, 128 }
 0x2de   :  { %p599_p5 = scmp.ne.s32.totalorder %s777_s4, %s598_s15  ;;  %p602_p6 = scmp.lt.u32.totalorder %s598_s15, %s777_s4 }
 0x2e0   :  { %p604_p7 = pnand %p602_p6, %p599_p5 }
 0x2e2   :  { %607 = shalt.err (!%p604_p7)
}
 0x2e3   :  { %394 = dma.vmem_to_hbm [thread:$0]  %s392_s11, 128, %s777_s4, [#allocation3]  }
 0x2e4   :  { %608 = dma.done.wait [#allocation3], 128  }
 0x2e5   :  { %609 = vsyncadd [#allocation3], 4294967168 }
 0x2e6   :  { %398 = vsyncpa [#allocation3], 1 }

</bundles_post_ra>
